<compile_context>
chip_gen: v7x
topology: tpu7x:2x2x1
jax: 0.10.0
libtpu: 0.0.40
codegen_flags: <defaults>
</compile_context>

<pallas_src>
import math
import jax
import jax.numpy as jnp
from jax import lax
from jax.experimental import pallas as pl
from jax.experimental.pallas import tpu as pltpu

EMB = 32        # emb_size
HEADS = 2       # heads
FF_MULT = 4     # ff_hidden_mult
EPS = 1e-5      # nn.LayerNorm default eps
NEG_BIG = -1e30 # finite "masked" bias (avoids inf-inf NaN path of -inf masking)


def transformer_block_kernel(
    x_ref,        # (bb*T, E)   activations for this batch block, flattened rows
    mask_ref,     # (bb, 1, T)  key mask (1.0 keep / 0.0 mask)
    wqkv_ref,     # (E, 3*H*E)  fused [Wq | Wk | Wv]
    wo_ref,       # (H*E, E)
    bo_ref,       # (1, E)
    g1_ref, beta1_ref,          # (1, E)
    w1_ref, bff1_ref,           # (E, FF), (1, FF)
    w2_ref, bff2_ref,           # (FF, E), (1, E)
    g2_ref, beta2_ref,          # (1, E)
    o_ref,        # (bb*T, E)
):
    bb, _, t = mask_ref.shape
    e = x_ref.shape[1]
    h = wo_ref.shape[0] // e
    he = h * e
    scale = 1.0 / math.sqrt(e)

    x = x_ref[...]                                                    # (bb*t, e) f32

    # --- fused QKV projection: one wide MXU matmul for all rows / heads ---
    qkv = jnp.dot(x, wqkv_ref[...], preferred_element_type=jnp.float32)   # (bb*t, 3*he)

    # --- attention (per batch row / per head; bb and h are tiny -> static unroll) ---
    attended_rows = []
    for bi in range(bb):
        rows = slice(bi * t, (bi + 1) * t)                            # sublane-aligned (t == 8)
        # additive key-mask bias, hoisted out of the head loop
        mask_bias = jnp.where(mask_ref[bi] > 0.0, 0.0, NEG_BIG)       # (1, t)

        att_b = None
        for head in range(h):
            cq = slice(head * e, head * e + e)
            ck = slice(he + head * e, he + head * e + e)
            cv = slice(2 * he + head * e, 2 * he + head * e + e)
            qh = qkv[rows, cq] * scale                                # (t, e)
            kh = qkv[rows, ck]
            vh = qkv[rows, cv]

            # q @ k^T via last-dim contraction (no explicit transpose)
            s = lax.dot_general(qh, kh, (((1,), (1,)), ((), ())),
                                preferred_element_type=jnp.float32)   # (t, t)
            s = s + mask_bias
            s = s - jnp.max(s, axis=-1, keepdims=True)
            p = jnp.exp(s)
            p = p * pl.reciprocal(jnp.sum(p, axis=-1, keepdims=True), approx=True)

            ctx = jnp.dot(p, vh, preferred_element_type=jnp.float32)  # (t, e)
            part = jnp.dot(ctx, wo_ref[head * e:(head + 1) * e, :],
                           preferred_element_type=jnp.float32)        # (t, e)
            att_b = part if att_b is None else att_b + part
        attended_rows.append(att_b)

    attended = attended_rows[0] if bb == 1 else jnp.concatenate(attended_rows, axis=0)
    attended = attended + bo_ref[...]                                 # (bb*t, e)

    # --- residual + LayerNorm 1 (fused over all rows of the batch block) ---
    y = attended + x
    mu = jnp.mean(y, axis=-1, keepdims=True)
    var = jnp.mean((y - mu) ** 2, axis=-1, keepdims=True)
    y = (y - mu) * lax.rsqrt(var + EPS) * g1_ref[...] + beta1_ref[...]

    # dropout: identity in eval mode

    # --- feed forward (single wide matmuls for the whole batch block) ---
    hdn = jnp.dot(y, w1_ref[...], preferred_element_type=jnp.float32) + bff1_ref[...]
    hdn = jnp.maximum(hdn, 0.0)
    ff = jnp.dot(hdn, w2_ref[...], preferred_element_type=jnp.float32) + bff2_ref[...]

    # --- residual + LayerNorm 2 ---
    z = ff + y
    mu2 = jnp.mean(z, axis=-1, keepdims=True)
    var2 = jnp.mean((z - mu2) ** 2, axis=-1, keepdims=True)
    z = (z - mu2) * lax.rsqrt(var2 + EPS) * g2_ref[...] + beta2_ref[...]

    o_ref[...] = z.astype(o_ref.dtype)


def _default_batch_block(b):
    """Grid policy per TPU generation.

    Dual-TensorCore chips (v7x, also v4/v5p megacore) benefit from a size-b
    'parallel' batch axis so both cores get work.  Single-TC chips (v5e/v6e)
    prefer one grid step: the grid is a serial loop there and each step costs
    ~0.35 us of fixed overhead, which dominates this tiny kernel.
    """
    try:
        kind = jax.devices()[0].device_kind.lower()
    except Exception:
        return b
    dual_tc = any(s in kind for s in ("v7", "tpu7", "v4", "v5p"))
    return 1 if dual_tc else b


def transformer_block(x, mask, params, *, batch_block=None):
    b, t, e = x.shape
    if batch_block is None:
        batch_block = _default_batch_block(b)
    if batch_block < 1 or b % batch_block != 0:
        batch_block = 1
    bb = batch_block
    n_steps = b // bb

    p = params
    # fuse QKV weights once on the host side: (E, 3*H*E)
    wqkv = jnp.concatenate([p["wq"], p["wk"], p["wv"]], axis=1)
    ordered = [wqkv, p["wo"], p["bo"],
               p["g1"], p["beta1"],
               p["w1"], p["bff1"], p["w2"], p["bff2"],
               p["g2"], p["beta2"]]

    # present activations as a (b*t, e) slab (free XLA reshape outside the kernel)
    x2 = x.reshape(b * t, e)

    def full_spec(arr):
        nd = arr.ndim
        return pl.BlockSpec(arr.shape, lambda i, _nd=nd: (0,) * _nd)

    in_specs = (
        [pl.BlockSpec((bb * t, e), lambda i: (i, 0)),        # x rows for this batch block
         pl.BlockSpec((bb, 1, t), lambda i: (i, 0, 0))]      # mask for this batch block
        + [full_spec(a) for a in ordered]                     # weights broadcast
    )

    out = pl.pallas_call(
        transformer_block_kernel,
        out_shape=jax.ShapeDtypeStruct((b * t, e), jnp.float32),
        grid_spec=pltpu.PrefetchScalarGridSpec(
            num_scalar_prefetch=0,
            grid=(n_steps,),
            in_specs=in_specs,
            out_specs=pl.BlockSpec((bb * t, e), lambda i: (i, 0)),
        ),
        compiler_params=pltpu.CompilerParams(
            dimension_semantics=("parallel",)),
    )(x2, mask, *ordered)

    return out.reshape(b, t, e)


def ref_forward(x, mask, p):
    """Pure-JAX reference mirroring the PyTorch forward (eval mode)."""
    b, t, e = x.shape
    h = HEADS
    q = (x @ p["wq"]) / math.sqrt(e)
    k = x @ p["wk"]
    v = x @ p["wv"]

    def split(a):
        return a.reshape(b, t, h, e).transpose(0, 2, 1, 3)   # (b,h,t,e)

    q, k, v = split(q), split(k), split(v)
    dot = jnp.einsum("bhqe,bhke->bhqk", q, k)
    m = mask[:, None, :, :]                                   # (b,1,1,t)
    dot = jnp.where(m > 0, dot, -jnp.inf)
    attn = jax.nn.softmax(dot, axis=-1)
    ctx = jnp.einsum("bhqk,bhke->bhqe", attn, v)
    ctx = ctx.transpose(0, 2, 1, 3).reshape(b, t, h * e)
    attended = ctx @ p["wo"] + p["bo"]

    def ln(y, g, be):
        mu = y.mean(-1, keepdims=True)
        var = ((y - mu) ** 2).mean(-1, keepdims=True)
        return (y - mu) / jnp.sqrt(var + EPS) * g + be

    y = ln(attended + x, p["g1"], p["beta1"])
    ff = jnp.maximum(y @ p["w1"] + p["bff1"], 0.0) @ p["w2"] + p["bff2"]
    return ln(ff + y, p["g2"], p["beta2"])


def init_params(key, e=EMB, h=HEADS, ff_mult=FF_MULT):
    keys = jax.random.split(key, 12)
    ff = ff_mult * e
    s = 0.05
    return {
        "wq": jax.random.normal(keys[0], (e, h * e), jnp.float32) * s,
        "wk": jax.random.normal(keys[1], (e, h * e), jnp.float32) * s,
        "wv": jax.random.normal(keys[2], (e, h * e), jnp.float32) * s,
        "wo": jax.random.normal(keys[3], (h * e, e), jnp.float32) * s,
        "bo": jax.random.normal(keys[4], (1, e), jnp.float32) * s,
        "g1": 1.0 + jax.random.normal(keys[5], (1, e), jnp.float32) * 0.01,
        "beta1": jax.random.normal(keys[6], (1, e), jnp.float32) * 0.01,
        "w1": jax.random.normal(keys[7], (e, ff), jnp.float32) * s,
        "bff1": jax.random.normal(keys[8], (1, ff), jnp.float32) * s,
        "w2": jax.random.normal(keys[9], (ff, e), jnp.float32) * s,
        "bff2": jax.random.normal(keys[10], (1, e), jnp.float32) * s,
        "g2": 1.0 + jax.random.normal(keys[11], (1, e), jnp.float32) * 0.01,
        "beta2": jnp.zeros((1, e), jnp.float32),
    }


if __name__ == "__main__":
    B, T = 2, 8
    key = jax.random.PRNGKey(0)
    kx, kp = jax.random.split(key)

    x = jax.random.normal(kx, (B, T, EMB), jnp.float32)
    # mask: [batch, 1, key_len]; 1.0 = attend, 0.0 = masked. Mask last 2 keys of batch 1.
    mask = jnp.ones((B, 1, T), jnp.float32)
    mask = mask.at[1, 0, T - 2:].set(0.0)

    params = init_params(kp)

    out = transformer_block(x, mask, params)
    out = jax.block_until_ready(out)

    ref = ref_forward(x, mask, params)
    assert out.shape == (B, T, EMB)
    # slightly looser than 1e-4 to accommodate the approx-reciprocal softmax
    assert jnp.allclose(out, ref, rtol=1e-3, atol=1e-3), (
        f"max abs diff {jnp.max(jnp.abs(out - ref))}")

    print("KERNEL_OK")
</pallas_src>

<mosaic_0001>
module attributes {stable_mosaic.version = 11 : i64} {
  func.func @transformer_block_kernel(%arg0: i32, %arg1: memref<16x32xf32, #tpu.memory_space<vmem>>, %arg2: memref<2x1x8xf32, #tpu.memory_space<vmem>>, %arg3: memref<32x192xf32, #tpu.memory_space<vmem>>, %arg4: memref<64x32xf32, #tpu.memory_space<vmem>>, %arg5: memref<1x32xf32, #tpu.memory_space<vmem>>, %arg6: memref<1x32xf32, #tpu.memory_space<vmem>>, %arg7: memref<1x32xf32, #tpu.memory_space<vmem>>, %arg8: memref<32x128xf32, #tpu.memory_space<vmem>>, %arg9: memref<1x128xf32, #tpu.memory_space<vmem>>, %arg10: memref<128x32xf32, #tpu.memory_space<vmem>>, %arg11: memref<1x32xf32, #tpu.memory_space<vmem>>, %arg12: memref<1x32xf32, #tpu.memory_space<vmem>>, %arg13: memref<1x32xf32, #tpu.memory_space<vmem>>, %arg14: memref<16x32xf32, #tpu.memory_space<vmem>>) attributes {dimension_semantics = [#tpu.dimension_semantics<parallel>], iteration_bounds = array<i64: 1>, scalar_prefetch = 0 : i64, scratch_operands = 0 : i64, tpu.core_type = #tpu.core_type<tc>, window_params = [{transform_indices = @transform_0, window_bounds = array<i64: 16, 32>}, {transform_indices = @transform_1, window_bounds = array<i64: 2, 1, 8>}, {pipeline_mode = #tpu.pipeline_mode<synchronous>, transform_indices = @transform_2, window_bounds = array<i64: 32, 192>}, {pipeline_mode = #tpu.pipeline_mode<synchronous>, transform_indices = @transform_3, window_bounds = array<i64: 64, 32>}, {pipeline_mode = #tpu.pipeline_mode<synchronous>, transform_indices = @transform_4, window_bounds = array<i64: 1, 32>}, {pipeline_mode = #tpu.pipeline_mode<synchronous>, transform_indices = @transform_5, window_bounds = array<i64: 1, 32>}, {pipeline_mode = #tpu.pipeline_mode<synchronous>, transform_indices = @transform_6, window_bounds = array<i64: 1, 32>}, {pipeline_mode = #tpu.pipeline_mode<synchronous>, transform_indices = @transform_7, window_bounds = array<i64: 32, 128>}, {pipeline_mode = #tpu.pipeline_mode<synchronous>, transform_indices = @transform_8, window_bounds = array<i64: 1, 128>}, {pipeline_mode = #tpu.pipeline_mode<synchronous>, transform_indices = @transform_9, window_bounds = array<i64: 128, 32>}, {pipeline_mode = #tpu.pipeline_mode<synchronous>, transform_indices = @transform_10, window_bounds = array<i64: 1, 32>}, {pipeline_mode = #tpu.pipeline_mode<synchronous>, transform_indices = @transform_11, window_bounds = array<i64: 1, 32>}, {pipeline_mode = #tpu.pipeline_mode<synchronous>, transform_indices = @transform_12, window_bounds = array<i64: 1, 32>}, {transform_indices = @transform_13, window_bounds = array<i64: 16, 32>}]} {
    %c0 = arith.constant 0 : index
    %c0_0 = arith.constant 0 : index
    %0 = vector.load %arg1[%c0, %c0_0] : memref<16x32xf32, #tpu.memory_space<vmem>>, vector<16x32xf32>
    %c0_1 = arith.constant 0 : index
    %c0_2 = arith.constant 0 : index
    %1 = vector.load %arg3[%c0_1, %c0_2] : memref<32x192xf32, #tpu.memory_space<vmem>>, vector<32x192xf32>
    %cst = arith.constant dense<0.000000e+00> : vector<16x192xf32>
    %2 = tpu.matmul %0, %1, %cst {dimension_numbers = #tpu.dot_dimension_numbers<[1], [0], [0], [1], [0, 0, 1, 1], [], []>} : vector<16x32xf32>, vector<32x192xf32>, vector<16x192xf32> -> vector<16x192xf32>
    %c0_3 = arith.constant 0 : index
    %c0_4 = arith.constant 0 : index
    %c0_5 = arith.constant 0 : index
    %3 = vector.load %arg2[%c0_3, %c0_4, %c0_5] : memref<2x1x8xf32, #tpu.memory_space<vmem>>, vector<1x1x8xf32>
    %4 = vector.shape_cast %3 : vector<1x1x8xf32> to vector<1x8xf32>
    %cst_6 = arith.constant 0.000000e+00 : f32
    %5 = vector.broadcast %cst_6 : f32 to vector<1x8xf32>
    %6 = arith.cmpf ogt, %4, %5 : vector<1x8xf32>
    %cst_7 = arith.constant 0.000000e+00 : f32
    %cst_8 = arith.constant -1.000000e+30 : f32
    %7 = vector.broadcast %cst_7 : f32 to vector<1x8xf32>
    %8 = vector.broadcast %cst_8 : f32 to vector<1x8xf32>
    %9 = arith.select %6, %7, %8 : vector<1x8xi1>, vector<1x8xf32>
    %10 = vector.extract_strided_slice %2 {offsets = [0, 0], sizes = [8, 32], strides = [1, 1]} : vector<16x192xf32> to vector<8x32xf32>
    %cst_9 = arith.constant 0.176776692 : f32
    %11 = vector.broadcast %cst_9 : f32 to vector<8x32xf32>
    %12 = arith.mulf %10, %11 : vector<8x32xf32>
    %13 = vector.extract_strided_slice %2 {offsets = [0, 64], sizes = [8, 32], strides = [1, 1]} : vector<16x192xf32> to vector<8x32xf32>
    %14 = vector.extract_strided_slice %2 {offsets = [0, 128], sizes = [8, 32], strides = [1, 1]} : vector<16x192xf32> to vector<8x32xf32>
    %cst_10 = arith.constant dense<0.000000e+00> : vector<8x8xf32>
    %15 = tpu.matmul %12, %13, %cst_10 {dimension_numbers = #tpu.dot_dimension_numbers<[1], [1], [0], [0], [0, 0, 1, 0], [], []>} : vector<8x32xf32>, vector<8x32xf32>, vector<8x8xf32> -> vector<8x8xf32>
    %16 = vector.broadcast %9 : vector<1x8xf32> to vector<8x8xf32>
    %17 = arith.addf %15, %16 : vector<8x8xf32>
    %cst_11 = arith.constant dense<0xFF800000> : vector<8xf32>
    %18 = vector.multi_reduction <maximumf>, %17, %cst_11 [1] : vector<8x8xf32> to vector<8xf32>
    %19 = vector.shape_cast %18 : vector<8xf32> to vector<8x1xf32>
    %20 = vector.broadcast %19 : vector<8x1xf32> to vector<8x8xf32>
    %21 = arith.subf %17, %20 : vector<8x8xf32>
    %22 = math.exp %21 : vector<8x8xf32>
    %cst_12 = arith.constant dense<0.000000e+00> : vector<8xf32>
    %23 = vector.multi_reduction <add>, %22, %cst_12 [1] : vector<8x8xf32> to vector<8xf32>
    %24 = vector.shape_cast %23 : vector<8xf32> to vector<8x1xf32>
    %25 = tpu.reciprocal %24 {approx = true} : vector<8x1xf32> -> vector<8x1xf32>
    %26 = vector.broadcast %25 : vector<8x1xf32> to vector<8x8xf32>
    %27 = arith.mulf %22, %26 : vector<8x8xf32>
    %cst_13 = arith.constant dense<0.000000e+00> : vector<8x32xf32>
    %28 = tpu.matmul %27, %14, %cst_13 {dimension_numbers = #tpu.dot_dimension_numbers<[1], [0], [0], [1], [0, 0, 1, 1], [], []>} : vector<8x8xf32>, vector<8x32xf32>, vector<8x32xf32> -> vector<8x32xf32>
    %c0_14 = arith.constant 0 : index
    %c0_15 = arith.constant 0 : index
    %29 = vector.load %arg4[%c0_14, %c0_15] : memref<64x32xf32, #tpu.memory_space<vmem>>, vector<32x32xf32>
    %cst_16 = arith.constant dense<0.000000e+00> : vector<8x32xf32>
    %30 = tpu.matmul %28, %29, %cst_16 {dimension_numbers = #tpu.dot_dimension_numbers<[1], [0], [0], [1], [0, 0, 1, 1], [], []>} : vector<8x32xf32>, vector<32x32xf32>, vector<8x32xf32> -> vector<8x32xf32>
    %31 = vector.extract_strided_slice %2 {offsets = [0, 32], sizes = [8, 32], strides = [1, 1]} : vector<16x192xf32> to vector<8x32xf32>
    %cst_17 = arith.constant 0.176776692 : f32
    %32 = vector.broadcast %cst_17 : f32 to vector<8x32xf32>
    %33 = arith.mulf %31, %32 : vector<8x32xf32>
    %34 = vector.extract_strided_slice %2 {offsets = [0, 96], sizes = [8, 32], strides = [1, 1]} : vector<16x192xf32> to vector<8x32xf32>
    %35 = vector.extract_strided_slice %2 {offsets = [0, 160], sizes = [8, 32], strides = [1, 1]} : vector<16x192xf32> to vector<8x32xf32>
    %cst_18 = arith.constant dense<0.000000e+00> : vector<8x8xf32>
    %36 = tpu.matmul %33, %34, %cst_18 {dimension_numbers = #tpu.dot_dimension_numbers<[1], [1], [0], [0], [0, 0, 1, 0], [], []>} : vector<8x32xf32>, vector<8x32xf32>, vector<8x8xf32> -> vector<8x8xf32>
    %37 = vector.broadcast %9 : vector<1x8xf32> to vector<8x8xf32>
    %38 = arith.addf %36, %37 : vector<8x8xf32>
    %cst_19 = arith.constant dense<0xFF800000> : vector<8xf32>
    %39 = vector.multi_reduction <maximumf>, %38, %cst_19 [1] : vector<8x8xf32> to vector<8xf32>
    %40 = vector.shape_cast %39 : vector<8xf32> to vector<8x1xf32>
    %41 = vector.broadcast %40 : vector<8x1xf32> to vector<8x8xf32>
    %42 = arith.subf %38, %41 : vector<8x8xf32>
    %43 = math.exp %42 : vector<8x8xf32>
    %cst_20 = arith.constant dense<0.000000e+00> : vector<8xf32>
    %44 = vector.multi_reduction <add>, %43, %cst_20 [1] : vector<8x8xf32> to vector<8xf32>
    %45 = vector.shape_cast %44 : vector<8xf32> to vector<8x1xf32>
    %46 = tpu.reciprocal %45 {approx = true} : vector<8x1xf32> -> vector<8x1xf32>
    %47 = vector.broadcast %46 : vector<8x1xf32> to vector<8x8xf32>
    %48 = arith.mulf %43, %47 : vector<8x8xf32>
    %cst_21 = arith.constant dense<0.000000e+00> : vector<8x32xf32>
    %49 = tpu.matmul %48, %35, %cst_21 {dimension_numbers = #tpu.dot_dimension_numbers<[1], [0], [0], [1], [0, 0, 1, 1], [], []>} : vector<8x8xf32>, vector<8x32xf32>, vector<8x32xf32> -> vector<8x32xf32>
    %c32 = arith.constant 32 : index
    %c0_22 = arith.constant 0 : index
    %50 = vector.load %arg4[%c32, %c0_22] : memref<64x32xf32, #tpu.memory_space<vmem>>, vector<32x32xf32>
    %cst_23 = arith.constant dense<0.000000e+00> : vector<8x32xf32>
    %51 = tpu.matmul %49, %50, %cst_23 {dimension_numbers = #tpu.dot_dimension_numbers<[1], [0], [0], [1], [0, 0, 1, 1], [], []>} : vector<8x32xf32>, vector<32x32xf32>, vector<8x32xf32> -> vector<8x32xf32>
    %52 = arith.addf %30, %51 : vector<8x32xf32>
    %c1 = arith.constant 1 : index
    %c0_24 = arith.constant 0 : index
    %c0_25 = arith.constant 0 : index
    %53 = vector.load %arg2[%c1, %c0_24, %c0_25] : memref<2x1x8xf32, #tpu.memory_space<vmem>>, vector<1x1x8xf32>
    %54 = vector.shape_cast %53 : vector<1x1x8xf32> to vector<1x8xf32>
    %cst_26 = arith.constant 0.000000e+00 : f32
    %55 = vector.broadcast %cst_26 : f32 to vector<1x8xf32>
    %56 = arith.cmpf ogt, %54, %55 : vector<1x8xf32>
    %cst_27 = arith.constant 0.000000e+00 : f32
    %cst_28 = arith.constant -1.000000e+30 : f32
    %57 = vector.broadcast %cst_27 : f32 to vector<1x8xf32>
    %58 = vector.broadcast %cst_28 : f32 to vector<1x8xf32>
    %59 = arith.select %56, %57, %58 : vector<1x8xi1>, vector<1x8xf32>
    %60 = vector.extract_strided_slice %2 {offsets = [8, 0], sizes = [8, 32], strides = [1, 1]} : vector<16x192xf32> to vector<8x32xf32>
    %cst_29 = arith.constant 0.176776692 : f32
    %61 = vector.broadcast %cst_29 : f32 to vector<8x32xf32>
    %62 = arith.mulf %60, %61 : vector<8x32xf32>
    %63 = vector.extract_strided_slice %2 {offsets = [8, 64], sizes = [8, 32], strides = [1, 1]} : vector<16x192xf32> to vector<8x32xf32>
    %64 = vector.extract_strided_slice %2 {offsets = [8, 128], sizes = [8, 32], strides = [1, 1]} : vector<16x192xf32> to vector<8x32xf32>
    %cst_30 = arith.constant dense<0.000000e+00> : vector<8x8xf32>
    %65 = tpu.matmul %62, %63, %cst_30 {dimension_numbers = #tpu.dot_dimension_numbers<[1], [1], [0], [0], [0, 0, 1, 0], [], []>} : vector<8x32xf32>, vector<8x32xf32>, vector<8x8xf32> -> vector<8x8xf32>
    %66 = vector.broadcast %59 : vector<1x8xf32> to vector<8x8xf32>
    %67 = arith.addf %65, %66 : vector<8x8xf32>
    %cst_31 = arith.constant dense<0xFF800000> : vector<8xf32>
    %68 = vector.multi_reduction <maximumf>, %67, %cst_31 [1] : vector<8x8xf32> to vector<8xf32>
    %69 = vector.shape_cast %68 : vector<8xf32> to vector<8x1xf32>
    %70 = vector.broadcast %69 : vector<8x1xf32> to vector<8x8xf32>
    %71 = arith.subf %67, %70 : vector<8x8xf32>
    %72 = math.exp %71 : vector<8x8xf32>
    %cst_32 = arith.constant dense<0.000000e+00> : vector<8xf32>
    %73 = vector.multi_reduction <add>, %72, %cst_32 [1] : vector<8x8xf32> to vector<8xf32>
    %74 = vector.shape_cast %73 : vector<8xf32> to vector<8x1xf32>
    %75 = tpu.reciprocal %74 {approx = true} : vector<8x1xf32> -> vector<8x1xf32>
    %76 = vector.broadcast %75 : vector<8x1xf32> to vector<8x8xf32>
    %77 = arith.mulf %72, %76 : vector<8x8xf32>
    %cst_33 = arith.constant dense<0.000000e+00> : vector<8x32xf32>
    %78 = tpu.matmul %77, %64, %cst_33 {dimension_numbers = #tpu.dot_dimension_numbers<[1], [0], [0], [1], [0, 0, 1, 1], [], []>} : vector<8x8xf32>, vector<8x32xf32>, vector<8x32xf32> -> vector<8x32xf32>
    %c0_34 = arith.constant 0 : index
    %c0_35 = arith.constant 0 : index
    %79 = vector.load %arg4[%c0_34, %c0_35] : memref<64x32xf32, #tpu.memory_space<vmem>>, vector<32x32xf32>
    %cst_36 = arith.constant dense<0.000000e+00> : vector<8x32xf32>
    %80 = tpu.matmul %78, %79, %cst_36 {dimension_numbers = #tpu.dot_dimension_numbers<[1], [0], [0], [1], [0, 0, 1, 1], [], []>} : vector<8x32xf32>, vector<32x32xf32>, vector<8x32xf32> -> vector<8x32xf32>
    %81 = vector.extract_strided_slice %2 {offsets = [8, 32], sizes = [8, 32], strides = [1, 1]} : vector<16x192xf32> to vector<8x32xf32>
    %cst_37 = arith.constant 0.176776692 : f32
    %82 = vector.broadcast %cst_37 : f32 to vector<8x32xf32>
    %83 = arith.mulf %81, %82 : vector<8x32xf32>
    %84 = vector.extract_strided_slice %2 {offsets = [8, 96], sizes = [8, 32], strides = [1, 1]} : vector<16x192xf32> to vector<8x32xf32>
    %85 = vector.extract_strided_slice %2 {offsets = [8, 160], sizes = [8, 32], strides = [1, 1]} : vector<16x192xf32> to vector<8x32xf32>
    %cst_38 = arith.constant dense<0.000000e+00> : vector<8x8xf32>
    %86 = tpu.matmul %83, %84, %cst_38 {dimension_numbers = #tpu.dot_dimension_numbers<[1], [1], [0], [0], [0, 0, 1, 0], [], []>} : vector<8x32xf32>, vector<8x32xf32>, vector<8x8xf32> -> vector<8x8xf32>
    %87 = vector.broadcast %59 : vector<1x8xf32> to vector<8x8xf32>
    %88 = arith.addf %86, %87 : vector<8x8xf32>
    %cst_39 = arith.constant dense<0xFF800000> : vector<8xf32>
    %89 = vector.multi_reduction <maximumf>, %88, %cst_39 [1] : vector<8x8xf32> to vector<8xf32>
    %90 = vector.shape_cast %89 : vector<8xf32> to vector<8x1xf32>
    %91 = vector.broadcast %90 : vector<8x1xf32> to vector<8x8xf32>
    %92 = arith.subf %88, %91 : vector<8x8xf32>
    %93 = math.exp %92 : vector<8x8xf32>
    %cst_40 = arith.constant dense<0.000000e+00> : vector<8xf32>
    %94 = vector.multi_reduction <add>, %93, %cst_40 [1] : vector<8x8xf32> to vector<8xf32>
    %95 = vector.shape_cast %94 : vector<8xf32> to vector<8x1xf32>
    %96 = tpu.reciprocal %95 {approx = true} : vector<8x1xf32> -> vector<8x1xf32>
    %97 = vector.broadcast %96 : vector<8x1xf32> to vector<8x8xf32>
    %98 = arith.mulf %93, %97 : vector<8x8xf32>
    %cst_41 = arith.constant dense<0.000000e+00> : vector<8x32xf32>
    %99 = tpu.matmul %98, %85, %cst_41 {dimension_numbers = #tpu.dot_dimension_numbers<[1], [0], [0], [1], [0, 0, 1, 1], [], []>} : vector<8x8xf32>, vector<8x32xf32>, vector<8x32xf32> -> vector<8x32xf32>
    %c32_42 = arith.constant 32 : index
    %c0_43 = arith.constant 0 : index
    %100 = vector.load %arg4[%c32_42, %c0_43] : memref<64x32xf32, #tpu.memory_space<vmem>>, vector<32x32xf32>
    %cst_44 = arith.constant dense<0.000000e+00> : vector<8x32xf32>
    %101 = tpu.matmul %99, %100, %cst_44 {dimension_numbers = #tpu.dot_dimension_numbers<[1], [0], [0], [1], [0, 0, 1, 1], [], []>} : vector<8x32xf32>, vector<32x32xf32>, vector<8x32xf32> -> vector<8x32xf32>
    %102 = arith.addf %80, %101 : vector<8x32xf32>
    %103 = tpu.concatenate %52, %102 in 0 : vector<8x32xf32>, vector<8x32xf32> -> vector<16x32xf32>
    %c0_45 = arith.constant 0 : index
    %c0_46 = arith.constant 0 : index
    %104 = vector.load %arg5[%c0_45, %c0_46] : memref<1x32xf32, #tpu.memory_space<vmem>>, vector<1x32xf32>
    %105 = vector.broadcast %104 : vector<1x32xf32> to vector<16x32xf32>
    %106 = arith.addf %103, %105 : vector<16x32xf32>
    %107 = arith.addf %106, %0 : vector<16x32xf32>
    %cst_47 = arith.constant dense<0.000000e+00> : vector<16xf32>
    %108 = vector.multi_reduction <add>, %107, %cst_47 [1] : vector<16x32xf32> to vector<16xf32>
    %109 = vector.shape_cast %108 : vector<16xf32> to vector<16x1xf32>
    %cst_48 = arith.constant 3.200000e+01 : f32
    %110 = vector.broadcast %cst_48 : f32 to vector<16x1xf32>
    %111 = arith.divf %109, %110 : vector<16x1xf32>
    %112 = vector.broadcast %111 : vector<16x1xf32> to vector<16x32xf32>
    %113 = arith.subf %107, %112 : vector<16x32xf32>
    %114 = arith.mulf %113, %113 : vector<16x32xf32>
    %cst_49 = arith.constant dense<0.000000e+00> : vector<16xf32>
    %115 = vector.multi_reduction <add>, %114, %cst_49 [1] : vector<16x32xf32> to vector<16xf32>
    %116 = vector.shape_cast %115 : vector<16xf32> to vector<16x1xf32>
    %cst_50 = arith.constant 3.200000e+01 : f32
    %117 = vector.broadcast %cst_50 : f32 to vector<16x1xf32>
    %118 = arith.divf %116, %117 : vector<16x1xf32>
    %119 = vector.broadcast %111 : vector<16x1xf32> to vector<16x32xf32>
    %120 = arith.subf %107, %119 : vector<16x32xf32>
    %cst_51 = arith.constant 9.99999974E-6 : f32
    %121 = vector.broadcast %cst_51 : f32 to vector<16x1xf32>
    %122 = arith.addf %118, %121 : vector<16x1xf32>
    %123 = math.rsqrt %122 : vector<16x1xf32>
    %124 = vector.broadcast %123 : vector<16x1xf32> to vector<16x32xf32>
    %125 = arith.mulf %120, %124 : vector<16x32xf32>
    %c0_52 = arith.constant 0 : index
    %c0_53 = arith.constant 0 : index
    %126 = vector.load %arg6[%c0_52, %c0_53] : memref<1x32xf32, #tpu.memory_space<vmem>>, vector<1x32xf32>
    %127 = vector.broadcast %126 : vector<1x32xf32> to vector<16x32xf32>
    %128 = arith.mulf %125, %127 : vector<16x32xf32>
    %c0_54 = arith.constant 0 : index
    %c0_55 = arith.constant 0 : index
    %129 = vector.load %arg7[%c0_54, %c0_55] : memref<1x32xf32, #tpu.memory_space<vmem>>, vector<1x32xf32>
    %130 = vector.broadcast %129 : vector<1x32xf32> to vector<16x32xf32>
    %131 = arith.addf %128, %130 : vector<16x32xf32>
    %c0_56 = arith.constant 0 : index
    %c0_57 = arith.constant 0 : index
    %132 = vector.load %arg8[%c0_56, %c0_57] : memref<32x128xf32, #tpu.memory_space<vmem>>, vector<32x128xf32>
    %cst_58 = arith.constant dense<0.000000e+00> : vector<16x128xf32>
    %133 = tpu.matmul %131, %132, %cst_58 {dimension_numbers = #tpu.dot_dimension_numbers<[1], [0], [0], [1], [0, 0, 1, 1], [], []>} : vector<16x32xf32>, vector<32x128xf32>, vector<16x128xf32> -> vector<16x128xf32>
    %c0_59 = arith.constant 0 : index
    %c0_60 = arith.constant 0 : index
    %134 = vector.load %arg9[%c0_59, %c0_60] : memref<1x128xf32, #tpu.memory_space<vmem>>, vector<1x128xf32>
    %135 = vector.broadcast %134 : vector<1x128xf32> to vector<16x128xf32>
    %136 = arith.addf %133, %135 : vector<16x128xf32>
    %cst_61 = arith.constant 0.000000e+00 : f32
    %137 = vector.broadcast %cst_61 : f32 to vector<16x128xf32>
    %138 = arith.maximumf %136, %137 : vector<16x128xf32>
    %c0_62 = arith.constant 0 : index
    %c0_63 = arith.constant 0 : index
    %139 = vector.load %arg10[%c0_62, %c0_63] : memref<128x32xf32, #tpu.memory_space<vmem>>, vector<128x32xf32>
    %cst_64 = arith.constant dense<0.000000e+00> : vector<16x32xf32>
    %140 = tpu.matmul %138, %139, %cst_64 {dimension_numbers = #tpu.dot_dimension_numbers<[1], [0], [0], [1], [0, 0, 1, 1], [], []>} : vector<16x128xf32>, vector<128x32xf32>, vector<16x32xf32> -> vector<16x32xf32>
    %c0_65 = arith.constant 0 : index
    %c0_66 = arith.constant 0 : index
    %141 = vector.load %arg11[%c0_65, %c0_66] : memref<1x32xf32, #tpu.memory_space<vmem>>, vector<1x32xf32>
    %142 = vector.broadcast %141 : vector<1x32xf32> to vector<16x32xf32>
    %143 = arith.addf %140, %142 : vector<16x32xf32>
    %144 = arith.addf %143, %131 : vector<16x32xf32>
    %cst_67 = arith.constant dense<0.000000e+00> : vector<16xf32>
    %145 = vector.multi_reduction <add>, %144, %cst_67 [1] : vector<16x32xf32> to vector<16xf32>
    %146 = vector.shape_cast %145 : vector<16xf32> to vector<16x1xf32>
    %cst_68 = arith.constant 3.200000e+01 : f32
    %147 = vector.broadcast %cst_68 : f32 to vector<16x1xf32>
    %148 = arith.divf %146, %147 : vector<16x1xf32>
    %149 = vector.broadcast %148 : vector<16x1xf32> to vector<16x32xf32>
    %150 = arith.subf %144, %149 : vector<16x32xf32>
    %151 = arith.mulf %150, %150 : vector<16x32xf32>
    %cst_69 = arith.constant dense<0.000000e+00> : vector<16xf32>
    %152 = vector.multi_reduction <add>, %151, %cst_69 [1] : vector<16x32xf32> to vector<16xf32>
    %153 = vector.shape_cast %152 : vector<16xf32> to vector<16x1xf32>
    %cst_70 = arith.constant 3.200000e+01 : f32
    %154 = vector.broadcast %cst_70 : f32 to vector<16x1xf32>
    %155 = arith.divf %153, %154 : vector<16x1xf32>
    %156 = vector.broadcast %148 : vector<16x1xf32> to vector<16x32xf32>
    %157 = arith.subf %144, %156 : vector<16x32xf32>
    %cst_71 = arith.constant 9.99999974E-6 : f32
    %158 = vector.broadcast %cst_71 : f32 to vector<16x1xf32>
    %159 = arith.addf %155, %158 : vector<16x1xf32>
    %160 = math.rsqrt %159 : vector<16x1xf32>
    %161 = vector.broadcast %160 : vector<16x1xf32> to vector<16x32xf32>
    %162 = arith.mulf %157, %161 : vector<16x32xf32>
    %c0_72 = arith.constant 0 : index
    %c0_73 = arith.constant 0 : index
    %163 = vector.load %arg12[%c0_72, %c0_73] : memref<1x32xf32, #tpu.memory_space<vmem>>, vector<1x32xf32>
    %164 = vector.broadcast %163 : vector<1x32xf32> to vector<16x32xf32>
    %165 = arith.mulf %162, %164 : vector<16x32xf32>
    %c0_74 = arith.constant 0 : index
    %c0_75 = arith.constant 0 : index
    %166 = vector.load %arg13[%c0_74, %c0_75] : memref<1x32xf32, #tpu.memory_space<vmem>>, vector<1x32xf32>
    %167 = vector.broadcast %166 : vector<1x32xf32> to vector<16x32xf32>
    %168 = arith.addf %165, %167 : vector<16x32xf32>
    %c0_76 = arith.constant 0 : index
    %c0_77 = arith.constant 0 : index
    %169 = vector.load %arg14[%c0_76, %c0_77] : memref<16x32xf32, #tpu.memory_space<vmem>>, vector<16x32xf32>
    tpu.vector_store %arg14[%c0_76, %c0_77], %168 {strides = array<i32>} : memref<16x32xf32, #tpu.memory_space<vmem>>, vector<16x32xf32>,
    return
  }
  func.func @transform_0(%arg0: i32) -> (i32, i32) {
    %c0_i32 = arith.constant 0 : i32
    %c0_i32_0 = arith.constant 0 : i32
    return %arg0, %c0_i32 : i32, i32
  }
  func.func @transform_1(%arg0: i32) -> (i32, i32, i32) {
    %c0_i32 = arith.constant 0 : i32
    %c0_i32_0 = arith.constant 0 : i32
    %c0_i32_1 = arith.constant 0 : i32
    return %arg0, %c0_i32, %c0_i32_0 : i32, i32, i32
  }
  func.func @transform_2(%arg0: i32) -> (i32, i32) {
    %c0_i32 = arith.constant 0 : i32
    %c0_i32_0 = arith.constant 0 : i32
    %c0_i32_1 = arith.constant 0 : i32
    return %c0_i32, %c0_i32_0 : i32, i32
  }
  func.func @transform_3(%arg0: i32) -> (i32, i32) {
    %c0_i32 = arith.constant 0 : i32
    %c0_i32_0 = arith.constant 0 : i32
    %c0_i32_1 = arith.constant 0 : i32
    return %c0_i32, %c0_i32_0 : i32, i32
  }
  func.func @transform_4(%arg0: i32) -> (i32, i32) {
    %c0_i32 = arith.constant 0 : i32
    %c0_i32_0 = arith.constant 0 : i32
    %c0_i32_1 = arith.constant 0 : i32
    return %c0_i32, %c0_i32_0 : i32, i32
  }
  func.func @transform_5(%arg0: i32) -> (i32, i32) {
    %c0_i32 = arith.constant 0 : i32
    %c0_i32_0 = arith.constant 0 : i32
    %c0_i32_1 = arith.constant 0 : i32
    return %c0_i32, %c0_i32_0 : i32, i32
  }
  func.func @transform_6(%arg0: i32) -> (i32, i32) {
    %c0_i32 = arith.constant 0 : i32
    %c0_i32_0 = arith.constant 0 : i32
    %c0_i32_1 = arith.constant 0 : i32
    return %c0_i32, %c0_i32_0 : i32, i32
  }
  func.func @transform_7(%arg0: i32) -> (i32, i32) {
    %c0_i32 = arith.constant 0 : i32
    %c0_i32_0 = arith.constant 0 : i32
    %c0_i32_1 = arith.constant 0 : i32
    return %c0_i32, %c0_i32_0 : i32, i32
  }
  func.func @transform_8(%arg0: i32) -> (i32, i32) {
    %c0_i32 = arith.constant 0 : i32
    %c0_i32_0 = arith.constant 0 : i32
    %c0_i32_1 = arith.constant 0 : i32
    return %c0_i32, %c0_i32_0 : i32, i32
  }
  func.func @transform_9(%arg0: i32) -> (i32, i32) {
    %c0_i32 = arith.constant 0 : i32
    %c0_i32_0 = arith.constant 0 : i32
    %c0_i32_1 = arith.constant 0 : i32
    return %c0_i32, %c0_i32_0 : i32, i32
  }
  func.func @transform_10(%arg0: i32) -> (i32, i32) {
    %c0_i32 = arith.constant 0 : i32
    %c0_i32_0 = arith.constant 0 : i32
    %c0_i32_1 = arith.constant 0 : i32
    return %c0_i32, %c0_i32_0 : i32, i32
  }
  func.func @transform_11(%arg0: i32) -> (i32, i32) {
    %c0_i32 = arith.constant 0 : i32
    %c0_i32_0 = arith.constant 0 : i32
    %c0_i32_1 = arith.constant 0 : i32
    return %c0_i32, %c0_i32_0 : i32, i32
  }
  func.func @transform_12(%arg0: i32) -> (i32, i32) {
    %c0_i32 = arith.constant 0 : i32
    %c0_i32_0 = arith.constant 0 : i32
    %c0_i32_1 = arith.constant 0 : i32
    return %c0_i32, %c0_i32_0 : i32, i32
  }
  func.func @transform_13(%arg0: i32) -> (i32, i32) {
    %c0_i32 = arith.constant 0 : i32
    %c0_i32_0 = arith.constant 0 : i32
    return %arg0, %c0_i32 : i32, i32
  }
}

</mosaic_0001>

<bundles_post_ra>
// kernel: tpu_custom_call.1
= control target key start
LH: loop header
LB: loop body
LE: loop exit
PB: predicated region body
PF: predicated region fallthrough
CT: control target
= control target key end

     0   :  { %v1777_v7 = vmov 0.0   ;;  %s2136_s0 = inlined_call_operand.vmem [shape: f32[16,32], index: 0, kind: input, shape index: {}]   ;;  %s2137_s1 = inlined_call_operand.vmem [shape: f32[2,1,8], index: 1, kind: input, shape index: {}]   ;;  %s2138_s2 = inlined_call_operand.vmem [shape: f32[32,192], index: 2, kind: input, shape index: {}]   ;;  %s2139_s3 = inlined_call_operand.vmem [shape: f32[64,32], index: 3, kind: input, shape index: {}]   ;;  %s2140_s4 = inlined_call_operand.vmem [shape: f32[1,32], index: 4, kind: input, shape index: {}]   ;;  %s2141_s5 = inlined_call_operand.vmem [shape: f32[1,32], index: 5, kind: input, shape index: {}]   ;;  %s2142_s6 = inlined_call_operand.vmem [shape: f32[1,32], index: 6, kind: input, shape index: {}]   ;;  %s2143_s7 = inlined_call_operand.vmem [shape: f32[32,128], index: 7, kind: input, shape index: {}]   ;;  %s2144_s8 = inlined_call_operand.vmem [shape: f32[1,128], index: 8, kind: input, shape index: {}]   ;;  %s2145_s9 = inlined_call_operand.vmem [shape: f32[128,32], index: 9, kind: input, shape index: {}]   ;;  %s2146_s10 = inlined_call_operand.vmem [shape: f32[1,32], index: 10, kind: input, shape index: {}]   ;;  %s2147_s11 = inlined_call_operand.vmem [shape: f32[1,32], index: 11, kind: input, shape index: {}]   ;;  %s2148_s12 = inlined_call_operand.vmem [shape: f32[1,32], index: 12, kind: input, shape index: {}]   ;;  %s2149_s13 = inlined_call_operand.hbm [shape: f32[16,32], index: 13, kind: output, shape index: {}]  }
   0x1   :  { %v48_v0 = vld [vmem:[%s2138_s2 + $0x8] sm:$0xff]  ;;  %v50_v1 = vld [vmem:[%s2138_s2 + $0x18] sm:$0xff]  ;;  %v47_v2 = vld [vmem:[%s2138_s2] sm:$0xff]  ;;  %126 = vmatprep.mubr.f32.mxu1 %v1777_v7  ;;  %1532 = vmatprep.subr.mxu0 %v1777_v7 }
   0x2   :  { %v1647_v3 = vpack.c.bf16 %v50_v1, %v48_v0  ;;  %v49_v4 = vld [vmem:[%s2138_s2 + $0x10] sm:$0xff]  ;;  %v52_v5 = vld [vmem:[%s2138_s2 + $0x28] sm:$0xff]  ;;  %v54_v6 = vld [vmem:[%s2138_s2 + $0x38] sm:$0xff] }
   0x3   :  { %v1649_v8 = vpack.c.bf16 %v49_v4, %v47_v2  ;;  %v1651_v9 = vpack.c.bf16 %v54_v6, %v52_v5  ;;  %v51_v10 = vld [vmem:[%s2138_s2 + $0x20] sm:$0xff]  ;;  %v53_v11 = vld [vmem:[%s2138_s2 + $0x30] sm:$0xff] }
   0x4   :  { %1648 = vmatprep.subr.bf16.mxu1 %v1647_v3 }
   0x5   :  { %18 = vsyncpa [#allocation3], 0  ;;  %1650 = vmatpush1.bf16.msra.mxu1 %v1649_v8  ;;  %v1653_v12 = vpack.c.bf16 %v53_v11, %v51_v10  ;;  %v1886_v13 = vld [vmem:[%s2136_s0] sm:$0xff]  ;;  %vm55_vm0 = vcmask 261120   ;;  %v1895_v14 = vld [vmem:[%s2136_s0 + $0x8] sm:$0xff]  ;;  %vm1778_vm1 = vmmov 0   ;;  %v144_v21 = vlaneseq }
   0x6   :  { %1652 = vmatprep.subr.bf16.mxu1 %v1651_v9  ;;  %1534 = vmatprep.mubr.msk.f32.mxu0 %vm1778_vm1, %v1777_v7  ;;  %s1779_s27 = smov 32   ;;  %s1780_s28 = smov 64   ;;  %v139_v22 = vld [vmem:[%s2137_s1] sm:$0x1]  ;;  %v1781_v25 = vmov -1e+30  }
   0x7   :  { %v1916_v23 = vshrl.u32 %v144_v21, 7  ;;  %vm140_vm2 = vcmp.gt.f32.partialorder %v139_v22, 0.0  ;;  %vm227_vm3 = vcmask 64512   ;;  %s1782_s30 = smov 96   ;;  %v1783_v53 = vmov 0.0|0.0   ;;  %v482_v55 = vld [vmem:[%s2139_s3 + $0x20] sm:$0xff] }
   0x8   :  { %v141_v26 = vsel %vm140_vm2, 0.0, %v1781_v25  ;;  %v483_v56 = vld [vmem:[%s2139_s3 + $0x28] sm:$0xff]  ;;  %v484_v57 = vld [vmem:[%s2139_s3 + $0x30] sm:$0xff]  ;;  %v485_v59 = vld [vmem:[%s2139_s3 + $0x38] sm:$0xff]  ;;  %s1784_s14 = smov [#allocation2]  }
   0x9   :  { %1654 = vmatpush1.bf16.msra.mxu1 %v1653_v12  ;;  %v146_v24 = vsub.s32 0, %v1916_v23  ;;  %v1656_v58 = vpack.c.bf16 %v483_v56, %v482_v55  ;;  %v1659_v60 = vpack.c.bf16 %v485_v59, %v484_v57  ;;  %v312_v63 = vld [vmem:[%s2139_s3] sm:$0xff]  ;;  %v313_v0 = vld [vmem:[%s2139_s3 + $0x8] sm:$0xff]  ;;  %v314_v4 = vld [vmem:[%s2139_s3 + $0x10] sm:$0xff] }
   0xa   :  { %1517 = vmatprep.subr.mxu1 %v1777_v7  ;;  %v1960_v2 = vpack.c.bf16 %v313_v0, %v312_v63  ;;  %v315_v5 = vld [vmem:[%s2139_s3 + $0x18] sm:$0xff] }
   0xb   :  { %v147_v27 = vrot.slane %v141_v26, %v146_v24  ;;  %v1970_v6 = vpack.c.bf16 %v315_v5, %v314_v4 }
   0xc   :  { %1429 = vmatmul.mubr.msk.f32.vlgmr.msra.gmra.mrb[0].mxu1 %vm55_vm0, %v1886_v13 }
   0xd   :  { %132 = vmatprep.mubr.f32.mxu1 %v1777_v7 }
  0x10   :  { %1430 = vmatmul.mubr.msk.f32.gmra.mrb[2].mxu1 %vm55_vm0, %v1895_v14 }
  0x11   :  { %1519 = vmatprep.mubr.msk.f32.mxu1 %vm1778_vm1, %v1777_v7 }
  0xdf   :  { %v128_v15 = vpop.f32.mrb[0].mxu1 }
  0xe0   :  { %318 = vrot.lane.b32.xlu1 %v128_v15, %s1779_s27  ;;  %150 = vrot.lane.b32.xlu0 %v128_v15, %s1780_s28  ;;  %v130_v16 = vpop.f32.mrb[1].mxu1  ;;  %v142_v20 = vmul.f32 0.17677669, %v128_v15 }
  0xe3   :  { %v134_v17 = vpop.f32.mrb[2].mxu1 }
  0xe4   :  { %v1905_v18 = vpop.f32.mrb[3].mxu1  ;;  %v636_v54 = vmul.f32 0.17677669, %v134_v17 }
 0x152   :  { %v151_v19 = vpop.permute.xlu0 %150  ;;  %v319_v37 = vpop.permute.xlu1 %318 }
 0x153   :  { %1518 = vmatpush3.xpose.msk.msra.mxu1 %vm55_vm0, %v151_v19 }
 0x154   :  { %1522 = vmatprep.subr.mxu1 %v1777_v7 }
 0x156   :  { %1520 = vmatmul.mubr.msk.f32.vlgmr.msra.gmra.mrb[4].mxu1 %vm55_vm0, %v142_v20 }
 0x157   :  { %1523 = vmatpush3.msra.mxu1 %v130_v16  ;;  %1524 = vmatprep.mubr.msk.f32.mxu1 %vm1778_vm1, %v1777_v7 }
 0x158   :  { %1527 = vmatprep.subr.mxu1 %v1777_v7 }
 0x229   :  { %v223_v28 = vpop.f32.mrb[4].mxu1 }
 0x22a   :  { %v224_v29 = vadd.f32 %v223_v28, %v147_v27  ;;  %v1521_v30 = vpop.f32.mrb[5].mxu1 }
 0x22c   :  { %v228_v31 = vsel %vm227_vm3, %v224_v29, -inf }
 0x22d   :  { %229 = vmax.xlane.f32.xlu0 %v228_v31 }
 0x2ba   :  { %v230_v32 = vpop.xlane.xlu0 %229 }
 0x2bb   :  { %v231_v33 = vsub.f32 %v224_v29, %v230_v32 }
 0x2bd   :  { %v232_v34 = vmul.f32 1.442695, %v231_v33 }
 0x2bf   :  { %1729 = vpow2.f32 %v232_v34 }
 0x2c9   :  { %v1730_v35 = vpop.eup %1729 }
 0x2ca   :  { %v234_v36 = vsel %vm227_vm3, %v1730_v35, 0.0 }
 0x2cb   :  { %235 = vadd.xlane.f32.xlu1 %v234_v36 }
 0x2dc   :  { %316 = vrot.lane.b32.xlu1 %v142_v20, %s1782_s30 }
 0x358   :  { %v236_v38 = vpop.xlane.xlu1 %235 }
 0x359   :  { %1731 = vrcp.f32 %v236_v38 }
 0x35c   :  { %v317_v41 = vpop.permute.xlu1 %316 }
 0x363   :  { %v1732_v39 = vpop.eup %1731 }
 0x364   :  { %v238_v40 = vmul.f32 %v1732_v39, %v1730_v35 }
 0x366   :  { %1525 = vmatmul.mubr.msk.f32.vlgmr.msra.gmra.mrb[6].mxu1 %vm227_vm3, %v238_v40 }
 0x367   :  { %1528 = vmatpush3.xpose.msk.msra.mxu1 %vm55_vm0, %v319_v37  ;;  %1529 = vmatprep.mubr.msk.f32.mxu1 %vm1778_vm1, %v1777_v7 }
 0x368   :  { %1655 = vmatprep.subr.bf16.mxu1 %v1783_v53 }
 0x36a   :  { %1530 = vmatmul.mubr.msk.f32.vlgmr.msra.gmra.mrb[8].mxu1 %vm55_vm0, %v317_v41 }
 0x36b   :  { %1545 = vmatprep.mubr.msk.f32.mxu1 %vm1778_vm1, %v1777_v7  ;;  %1657 = vmatpush3.bf16.msra.mxu1 %v1656_v58 }
 0x36c   :  { %1658 = vmatprep.subr.bf16.mxu1 %v1783_v53 }
 0x36f   :  { %1660 = vmatpush3.bf16.msra.mxu1 %v1659_v60 }
 0x370   :  { %1559 = vmatprep.subr.mxu1 %v1777_v7 }
 0x439   :  { %v308_v42 = vpop.f32.mrb[6].mxu1 }
 0x43a   :  { %v1526_v43 = vpop.f32.mrb[7].mxu1 }
 0x43d   :  { %v390_v44 = vpop.f32.mrb[8].mxu1 }
 0x43e   :  { %v391_v45 = vadd.f32 %v390_v44, %v147_v27  ;;  %v1531_v46 = vpop.f32.mrb[9].mxu1  ;;  %v1448_v27 = vld [vmem:[%s2140_s4] ss:$0 sm:$0xff] }
 0x440   :  { %v394_v47 = vsel %vm227_vm3, %v391_v45, -inf }
 0x441   :  { %395 = vmax.xlane.f32.xlu1 %v394_v47 }
 0x452   :  { %807 = vrot.lane.b32.xlu1 %v134_v17, %s1779_s27 }
 0x4ce   :  { %v396_v48 = vpop.xlane.xlu1 %395 }
 0x4cf   :  { %v397_v49 = vsub.f32 %v391_v45, %v396_v48 }
 0x4d1   :  { %v398_v50 = vmul.f32 1.442695, %v397_v49 }
 0x4d2   :  { %v808_v11 = vpop.permute.xlu1 %807 }
 0x4d3   :  { %1733 = vpow2.f32 %v398_v50 }
 0x4dd   :  { %v1734_v51 = vpop.eup %1733 }
 0x4de   :  { %v400_v52 = vsel %vm227_vm3, %v1734_v51, 0.0 }
 0x4df   :  { %401 = vadd.xlane.f32.xlu0 %v400_v52 }
 0x4f5   :  { %406 = vrot.lane.b32.xlu0 %v130_v16, %s1782_s30 }
 0x4f9   :  { %644 = vrot.lane.b32.xlu0 %v134_v17, %s1780_s28  ;;  %v1439_v17 = vld [vmem:[%s2137_s1 + $0x1] sm:$0x1]  ;;  %s1418_s1 = sshll.u32 %s1784_s14, 4  ;;  %s1419_s1 = int_to_ptr.vmem [resolvable:$true] %s1418_s1 }
 0x4fa   :  { %vm634_vm4 = vcmp.gt.f32.partialorder %v1439_v17, 0.0  ;;  %s1753_s4 = scalar_lea.vmem %s1419_s1, 256  ;;  %p1758_p1 = scmp.lt.s32.totalorder %s1419_s1, %s1419_s1 }
 0x4fb   :  { %v635_v19 = vsel %vm634_vm4, 0.0, %v1781_v25  ;;  %p1754_p0 = scmp.ne.s32.totalorder %s1419_s1, %s1753_s4  ;;  %p1759_p2 = scmp.lt.s32.totalorder %s1753_s4, %s1753_s4 }
 0x4fc   :  { %v641_v26 = vrot.slane %v635_v19, %v146_v24 }
 0x4fd   :  { %805 = vrot.lane.b32.xlu0 %v636_v54, %s1782_s30  ;;  %p1760_p3 = por %p1759_p2, %p1758_p1 }
 0x4ff   :  { %p1761_p4 = pnand %p1760_p3, %p1754_p0 }
 0x56c   :  { %v402_v61 = vpop.xlane.xlu0 %401 }
 0x56d   :  { %1735 = vrcp.f32 %v402_v61 }
 0x570   :  { %v407_v62 = vpop.permute.xlu0 %406 }
 0x571   :  { %1533 = vmatpush3.msra.mxu0 %v407_v62 }
 0x572   :  { %1661 = vmatprep.subr.bf16.mxu0 %v1783_v53 }
 0x574   :  { %v645_v9 = vpop.permute.xlu0 %644 }
 0x577   :  { %v1736_v1 = vpop.eup %1735 }
 0x578   :  { %v404_v3 = vmul.f32 %v1736_v1, %v1734_v51  ;;  %v806_v12 = vpop.permute.xlu0 %805 }
 0x57a   :  { %1535 = vmatmul.mubr.msk.f32.vlgmr.msra.gmra.mrb[0].mxu0 %vm227_vm3, %v404_v3 }
 0x57b   :  { %1663 = vmatpush3.bf16.msra.mxu0 %v1960_v2  ;;  %1556 = vmatprep.mubr.msk.f32.mxu0 %vm1778_vm1, %v1777_v7 }
 0x57c   :  { %1664 = vmatprep.subr.bf16.mxu0 %v1783_v53 }
 0x57f   :  { %1666 = vmatpush3.bf16.msra.mxu0 %v1970_v6 }
 0x580   :  { %1564 = vmatprep.subr.mxu0 %v1777_v7 }
 0x582   :  { %1557 = vmatmul.mubr.msk.f32.vlgmr.msra.gmra.mrb[2].mxu0 %vm55_vm0, %v308_v42 }
 0x583   :  { %1565 = vmatpush3.msra.mxu0 %v1905_v18  ;;  %1566 = vmatprep.mubr.msk.f32.mxu0 %vm1778_vm1, %v1777_v7 }
 0x584   :  { %1574 = vmatprep.subr.mxu0 %v1777_v7 }
 0x64d   :  { %v478_v8 = vpop.f32.mrb[0].mxu0 }
 0x64e   :  { %v1536_v10 = vpop.f32.mrb[1].mxu0  ;;  %1546 = vmatmul.mubr.msk.f32.vlgmr.msra.gmra.mrb[10].mxu1 %vm55_vm0, %v478_v8 }
 0x64f   :  { %1560 = vmatpush3.xpose.msk.msra.mxu1 %vm55_vm0, %v645_v9  ;;  %1561 = vmatprep.mubr.msk.f32.mxu1 %vm1778_vm1, %v1777_v7 }
 0x650   :  { %1569 = vmatprep.subr.mxu1 %v1777_v7 }
 0x652   :  { %1562 = vmatmul.mubr.msk.f32.vlgmr.msra.gmra.mrb[12].mxu1 %vm55_vm0, %v636_v54 }
 0x653   :  { %1570 = vmatpush3.xpose.msk.msra.mxu1 %vm55_vm0, %v808_v11  ;;  %1571 = vmatprep.mubr.msk.f32.mxu1 %vm1778_vm1, %v1777_v7 }
 0x654   :  { %1667 = vmatprep.subr.bf16.mxu1 %v1783_v53 }
 0x655   :  { %v628_v15 = vpop.f32.mrb[2].mxu0 }
 0x656   :  { %v1558_v16 = vpop.f32.mrb[3].mxu0  ;;  %1572 = vmatmul.mubr.msk.f32.vlgmr.msra.gmra.mrb[14].mxu1 %vm55_vm0, %v806_v12  ;;  %v1449_v12 = vld [vmem:[%s2141_s5] ss:$0 sm:$0xff] }
 0x657   :  { %1669 = vmatpush3.bf16.msra.mxu1 %v1656_v58  ;;  %1587 = vmatprep.mubr.msk.f32.mxu1 %vm1778_vm1, %v1777_v7  ;;  %v1450_v16 = vld [vmem:[%s2142_s6] ss:$0 sm:$0xff] }
 0x658   :  { %1670 = vmatprep.subr.bf16.mxu1 %v1783_v53 }
 0x65b   :  { %1672 = vmatpush3.bf16.msra.mxu1 %v1659_v60 }
 0x721   :  { %v555_v20 = vpop.f32.mrb[10].mxu1 }
 0x722   :  { %v629_v21 = vadd.f32 %v628_v15, %v555_v20  ;;  %v1547_v22 = vpop.f32.mrb[11].mxu1  ;;  %v1173_v20 = vld [vmem:[%s2143_s7] sm:$0xff] }
 0x724   :  { %v1124_v31 = vadd.f32 %v1448_v27, %v629_v21  ;;  %v1174_v21 = vld [vmem:[%s2143_s7 + $0x8] sm:$0xff] }
 0x725   :  { %v717_v28 = vpop.f32.mrb[12].mxu1  ;;  %v1679_v22 = vpack.c.bf16 %v1174_v21, %v1173_v20 }
 0x726   :  { %v718_v29 = vadd.f32 %v717_v28, %v641_v26  ;;  %v1563_v30 = vpop.f32.mrb[13].mxu1  ;;  %v1126_v36 = vadd.f32 %v1124_v31, %v1886_v13  ;;  %v1269_v31 = vld [vmem:[%s2145_s9 + $0x10] sm:$0xff] }
 0x727   :  { %1680 = vmatprep.subr.bf16.mxu1 %v1679_v22  ;;  %v1268_v30 = vld [vmem:[%s2145_s9 + $0x8] sm:$0xff] }
 0x728   :  { %v721_v32 = vsel %vm227_vm3, %v718_v29, -inf  ;;  %v1128_v23 = vsel %vm55_vm0, %v1126_v36, 0.0 }
 0x729   :  { %722 = vmax.xlane.f32.xlu0 %v721_v32  ;;  %v879_v33 = vpop.f32.mrb[14].mxu1 }
 0x72a   :  { %v880_v34 = vadd.f32 %v879_v33, %v641_v26  ;;  %v1573_v25 = vpop.f32.mrb[15].mxu1  ;;  %v1175_v26 = vld [vmem:[%s2143_s7 + $0x10] sm:$0xff]  ;;  %v1270_v33 = vld [vmem:[%s2145_s9 + $0x18] sm:$0xff] }
 0x72b   :  { %v1271_v25 = vld [vmem:[%s2145_s9 + $0x20] sm:$0xff] }
 0x72c   :  { %v883_v35 = vsel %vm227_vm3, %v880_v34, -inf }
 0x72d   :  { %884 = vmax.xlane.f32.xlu1 %v883_v35  ;;  %v1272_v35 = vld [vmem:[%s2145_s9 + $0x28] sm:$0xff] }
 0x731   :  { %1129 = vadd.xlane.f32.xlu1 %v1128_v23  ;;  %v1273_v23 = vld [vmem:[%s2145_s9 + $0x30] sm:$0xff] }
 0x7b6   :  { %v723_v24 = vpop.xlane.xlu0 %722 }
 0x7b7   :  { %v724_v37 = vsub.f32 %v718_v29, %v723_v24  ;;  %v1267_v29 = vld [vmem:[%s2145_s9] sm:$0xff]  ;;  %v1274_v24 = vld [vmem:[%s2145_s9 + $0x38] sm:$0xff] }
 0x7b8   :  { %v1687_v32 = vpack.c.bf16 %v1268_v30, %v1267_v29  ;;  %v1455_v29 = vld [vmem:[%s2147_s11] ss:$0 sm:$0xff] }
 0x7b9   :  { %v725_v38 = vmul.f32 1.442695, %v724_v37  ;;  %v1699_v37 = vpack.c.bf16 %v1274_v24, %v1273_v23 }
 0x7ba   :  { %v885_v39 = vpop.xlane.xlu1 %884 }
 0x7bb   :  { %1737 = vpow2.f32 %v725_v38  ;;  %v886_v40 = vsub.f32 %v880_v34, %v885_v39  ;;  %v1691_v34 = vpack.c.bf16 %v1270_v33, %v1269_v31  ;;  %v1275_v38 = vld [vmem:[%s2145_s9 + $0x40] sm:$0xff]  ;;  %v1276_v39 = vld [vmem:[%s2145_s9 + $0x48] sm:$0xff] }
 0x7bc   :  { %v1456_v31 = vld [vmem:[%s2148_s12] ss:$0 sm:$0xff] }
 0x7bd   :  { %v887_v41 = vmul.f32 1.442695, %v886_v40  ;;  %v1703_v40 = vpack.c.bf16 %v1276_v39, %v1275_v38 }
 0x7be   :  { %v1130_v56 = vpop.xlane.xlu1 %1129 }
 0x7bf   :  { %1739 = vpow2.f32 %v887_v41  ;;  %v1135_v59 = vmul.f32 0.03125, %v1130_v56  ;;  %v1277_v41 = vld [vmem:[%s2145_s9 + $0x50] sm:$0xff]  ;;  %v1451_v56 = vld [vmem:[%s2144_s8] ss:$0 sm:$0xff] }
 0x7c5   :  { %v1738_v42 = vpop.eup %1737 }
 0x7c6   :  { %v727_v43 = vsel %vm227_vm3, %v1738_v42, 0.0 }
 0x7c7   :  { %728 = vadd.xlane.f32.xlu0 %v727_v43 }
 0x7c9   :  { %v1740_v44 = vpop.eup %1739 }
 0x7ca   :  { %v889_v45 = vsel %vm227_vm3, %v1740_v44, 0.0 }
 0x7cb   :  { %890 = vadd.xlane.f32.xlu0 %v889_v45  ;;  %v1280_v45 = vld [vmem:[%s2145_s9 + $0x68] sm:$0xff] }
 0x7e1   :  { %895 = vrot.lane.b32.xlu0 %v1905_v18, %s1782_s30 }
 0x854   :  { %v729_v13 = vpop.xlane.xlu0 %728 }
 0x855   :  { %1741 = vrcp.f32 %v729_v13 }
 0x858   :  { %v891_v46 = vpop.xlane.xlu0 %890 }
 0x859   :  { %1743 = vrcp.f32 %v891_v46 }
 0x85c   :  { %v896_v49 = vpop.permute.xlu0 %895 }
 0x85f   :  { %v1742_v47 = vpop.eup %1741 }
 0x860   :  { %v731_v48 = vmul.f32 %v1742_v47, %v1738_v42  ;;  %v1278_v42 = vld [vmem:[%s2145_s9 + $0x58] sm:$0xff] }
 0x861   :  { %v1707_v43 = vpack.c.bf16 %v1278_v42, %v1277_v41 }
 0x862   :  { %1567 = vmatmul.mubr.msk.f32.vlgmr.msra.gmra.mrb[4].mxu0 %vm227_vm3, %v731_v48 }
 0x863   :  { %v1744_v50 = vpop.eup %1743  ;;  %1575 = vmatpush3.msra.mxu0 %v896_v49  ;;  %1576 = vmatprep.mubr.msk.f32.mxu0 %vm1778_vm1, %v1777_v7 }
 0x864   :  { %v893_v51 = vmul.f32 %v1744_v50, %v1740_v44  ;;  %1673 = vmatprep.subr.bf16.mxu0 %v1783_v53  ;;  %v1279_v44 = vld [vmem:[%s2145_s9 + $0x60] sm:$0xff] }
 0x865   :  { %v1711_v13 = vpack.c.bf16 %v1280_v45, %v1279_v44 }
 0x866   :  { %1577 = vmatmul.mubr.msk.f32.vlgmr.msra.gmra.mrb[6].mxu0 %vm227_vm3, %v893_v51 }
 0x867   :  { %1675 = vmatpush3.bf16.msra.mxu0 %v1960_v2  ;;  %1598 = vmatprep.mubr.msk.f32.mxu0 %vm1778_vm1, %v1777_v7  ;;  %v1137_v7 = vsub.f32 %v1126_v36, %v1135_v59  ;;  %v1695_v36 = vpack.c.bf16 %v1272_v35, %v1271_v25 }
 0x868   :  { %1676 = vmatprep.subr.bf16.mxu0 %v1783_v53 }
 0x869   :  { %v1139_v1 = vmul.f32 %v1137_v7, %v1137_v7 }
 0x86b   :  { %1678 = vmatpush3.bf16.msra.mxu0 %v1970_v6  ;;  %v1141_v2 = vsel %vm55_vm0, %v1139_v1, 0.0 }
 0x86c   :  { %1688 = vmatprep.subr.bf16.mxu0 %v1687_v32 }
 0x935   :  { %v801_v18 = vpop.f32.mrb[4].mxu0 }
 0x936   :  { %v1568_v52 = vpop.f32.mrb[5].mxu0  ;;  %1599 = vmatmul.mubr.msk.f32.vlgmr.msra.gmra.mrb[8].mxu0 %vm55_vm0, %v801_v18 }
 0x937   :  { %1690 = vmatpush3.bf16.msra.mxu0 %v1687_v32  ;;  %v1281_v52 = vld [vmem:[%s2145_s9 + $0x70] sm:$0xff] }
 0x938   :  { %1692 = vmatprep.subr.bf16.mxu0 %v1691_v34 }
 0x939   :  { %v967_v54 = vpop.f32.mrb[6].mxu0 }
 0x93a   :  { %v1578_v55 = vpop.f32.mrb[7].mxu0  ;;  %1588 = vmatmul.mubr.msk.f32.vlgmr.msra.gmra.mrb[16].mxu1 %vm55_vm0, %v967_v54  ;;  %v1282_v54 = vld [vmem:[%s2145_s9 + $0x78] sm:$0xff] }
 0x93b   :  { %1682 = vmatpush3.bf16.msra.mxu1 %v1679_v22  ;;  %1694 = vmatpush3.bf16.msra.mxu0 %v1691_v34  ;;  %v1715_v55 = vpack.c.bf16 %v1282_v54, %v1281_v52 }
 0x93c   :  { %1696 = vmatprep.subr.bf16.mxu0 %v1695_v36 }
 0x93f   :  { %1698 = vmatpush3.bf16.msra.mxu0 %v1695_v36 }
 0x940   :  { %1700 = vmatprep.subr.bf16.mxu0 %v1699_v37 }
 0x943   :  { %1702 = vmatpush3.bf16.msra.mxu0 %v1699_v37 }
 0x944   :  { %1704 = vmatprep.subr.bf16.mxu0 %v1703_v40 }
 0x947   :  { %1706 = vmatpush3.bf16.msra.mxu0 %v1703_v40 }
 0x948   :  { %1708 = vmatprep.subr.bf16.mxu0 %v1707_v43 }
 0x94b   :  { %1710 = vmatpush3.bf16.msra.mxu0 %v1707_v43 }
 0x94c   :  { %1712 = vmatprep.subr.bf16.mxu0 %v1711_v13 }
 0x94f   :  { %1714 = vmatpush3.bf16.msra.mxu0 %v1711_v13 }
 0x950   :  { %1716 = vmatprep.subr.bf16.mxu0 %v1715_v55 }
 0x953   :  { %1718 = vmatpush3.bf16.msra.mxu0 %v1715_v55 }
 0xa09   :  { %v1113_v57 = vpop.f32.mrb[8].mxu0 }
 0xa0a   :  { %v1600_v58 = vpop.f32.mrb[9].mxu0 }
 0xa0d   :  { %v1040_v60 = vpop.f32.mrb[16].mxu1 }
 0xa0e   :  { %v1114_v61 = vadd.f32 %v1113_v57, %v1040_v60  ;;  %v1589_v62 = vpop.f32.mrb[17].mxu1 }
 0xa10   :  { %v1125_v63 = vadd.f32 %v1448_v27, %v1114_v61  ;;  %v1176_v27 = vld [vmem:[%s2143_s7 + $0x18] sm:$0xff] }
 0xa11   :  { %v1683_v28 = vpack.c.bf16 %v1176_v27, %v1175_v26 }
 0xa12   :  { %v1127_v53 = vadd.f32 %v1125_v63, %v1895_v14 }
 0xa13   :  { %1684 = vmatprep.subr.bf16.mxu1 %v1683_v28 }
 0xa14   :  { %v1131_v0 = vsel %vm55_vm0, %v1127_v53, 0.0  ;;  %1686 = vmatpush3.bf16.msra.mxu1 %v1683_v28 }
 0xa15   :  { %1132 = vadd.xlane.f32.xlu1 %v1131_v0 }
 0xa19   :  { %1142 = vadd.xlane.f32.xlu1 %v1141_v2 }
 0xaa2   :  { %v1133_v3 = vpop.xlane.xlu1 %1132 }
 0xaa3   :  { %v1136_v4 = vmul.f32 0.03125, %v1133_v3 }
 0xaa5   :  { %v2028_v5 = vsub.f32 %v1127_v53, %v1136_v4 }
 0xaa6   :  { %v1143_v6 = vpop.xlane.xlu1 %1142 }
 0xaa7   :  { %v1147_v8 = vmul.f32 0.03125, %v1143_v6  ;;  %v1140_v9 = vmul.f32 %v2028_v5, %v2028_v5 }
 0xaa9   :  { %v1149_v10 = vadd.f32 1e-05, %v1147_v8  ;;  %v1144_v11 = vsel %vm55_vm0, %v1140_v9, 0.0 }
 0xaaa   :  { %1145 = vadd.xlane.f32.xlu1 %v1144_v11 }
 0xaab   :  { %1745 = vrsqrt.f32 %v1149_v10 }
 0xab5   :  { %v1746_v14 = vpop.eup %1745 }
 0xab6   :  { %v1153_v15 = vmul.f32 %v1746_v14, %v1137_v7  ;;  %v1454_v7 = vld [vmem:[%s2146_s10] ss:$0 sm:$0xff] }
 0xab8   :  { %v1162_v17 = vmul.f32 %v1449_v12, %v1153_v15 }
 0xaba   :  { %v2039_v19 = vadd.f32 %v1450_v16, %v1162_v17 }
 0xabc   :  { %1609 = vmatprep.mubr.msk.f32.mxu1 %vm55_vm0, %v2039_v19 }
 0xb37   :  { %v1146_v46 = vpop.xlane.xlu1 %1145 }
 0xb38   :  { %v1148_v47 = vmul.f32 0.03125, %v1146_v46 }
 0xb3a   :  { %v1150_v48 = vadd.f32 1e-05, %v1148_v47 }
 0xb3c   :  { %1747 = vrsqrt.f32 %v1150_v48 }
 0xb46   :  { %v1748_v49 = vpop.eup %1747 }
 0xb47   :  { %v1154_v50 = vmul.f32 %v1748_v49, %v2028_v5 }
 0xb49   :  { %v1163_v51 = vmul.f32 %v1449_v12, %v1154_v50 }
 0xb4b   :  { %v1172_v18 = vadd.f32 %v1450_v16, %v1163_v51 }
 0xb4d   :  { %1610 = vmatmul.mubr.msk.f32.vlgmr.msra.gmra.mrb[18].mxu1 %vm55_vm0, %v1172_v18 }
 0xc20   :  { %v1611_v57 = vpop.f32.mrb[18].mxu1 }
 0xc21   :  { %v1262_v58 = vadd.f32 %v1611_v57, %v1451_v56  ;;  %v1256_v59 = vpop.f32.mrb[19].mxu1 }
 0xc22   :  { %v1257_v60 = vadd.f32 %v1451_v56, %v1256_v59 }
 0xc23   :  { %v1266_v62 = vmax.f32 %v1262_v58, 0.0 }
 0xc24   :  { %v1265_v61 = vmax.f32 %v1257_v60, 0.0 }
 0xc26   :  { %1644 = vmatprep.mubr.f32.mxu0 %v1265_v61 }
 0xc27   :  { %1645 = vmatmul.mubr.f32.vlgmr.msra.gmra.mrb[10].mxu0 %v1266_v62 }
 0xcfa   :  { %v1646_v63 = vpop.f32.mrb[10].mxu0 }
 0xcfb   :  { %v1362_v53 = vadd.f32 %v1646_v63, %v1454_v7  ;;  %v1356_v0 = vpop.f32.mrb[11].mxu0 }
 0xcfc   :  { %v1357_v1 = vadd.f32 %v1454_v7, %v1356_v0 }
 0xcfd   :  { %v1366_v2 = vadd.f32 %v1362_v53, %v1172_v18 }
 0xcfe   :  { %v1365_v3 = vadd.f32 %v1357_v1, %v2039_v19 }
 0xcff   :  { %v1370_v4 = vsel %vm55_vm0, %v1366_v2, 0.0 }
 0xd00   :  { %1371 = vadd.xlane.f32.xlu1 %v1370_v4  ;;  %v1367_v5 = vsel %vm55_vm0, %v1365_v3, 0.0 }
 0xd01   :  { %1368 = vadd.xlane.f32.xlu0 %v1367_v5 }
 0xd8d   :  { %v1372_v6 = vpop.xlane.xlu1 %1371 }
 0xd8e   :  { %v1374_v8 = vmul.f32 0.03125, %v1372_v6  ;;  %v1369_v9 = vpop.xlane.xlu0 %1368 }
 0xd8f   :  { %v1373_v10 = vmul.f32 0.03125, %v1369_v9 }
 0xd90   :  { %v1376_v11 = vsub.f32 %v1366_v2, %v1374_v8 }
 0xd91   :  { %v1375_v14 = vsub.f32 %v1365_v3, %v1373_v10 }
 0xd92   :  { %v1378_v16 = vmul.f32 %v1376_v11, %v1376_v11 }
 0xd93   :  { %v1377_v12 = vmul.f32 %v1375_v14, %v1375_v14 }
 0xd94   :  { %v1382_v17 = vsel %vm55_vm0, %v1378_v16, 0.0 }
 0xd95   :  { %v1379_v15 = vsel %vm55_vm0, %v1377_v12, 0.0 }
 0xd96   :  { %1380 = vadd.xlane.f32.xlu1 %v1379_v15 }
 0xd9a   :  { %1383 = vadd.xlane.f32.xlu1 %v1382_v17 }
 0xe23   :  { %v1381_v19 = vpop.xlane.xlu1 %1380 }
 0xe24   :  { %v1385_v20 = vmul.f32 0.03125, %v1381_v19 }
 0xe26   :  { %v1387_v21 = vadd.f32 1e-05, %v1385_v20 }
 0xe27   :  { %v1384_v22 = vpop.xlane.xlu1 %1383 }
 0xe28   :  { %1749 = vrsqrt.f32 %v1387_v21  ;;  %v1386_v26 = vmul.f32 0.03125, %v1384_v22 }
 0xe2a   :  { %v1388_v27 = vadd.f32 1e-05, %v1386_v26 }
 0xe2c   :  { %1751 = vrsqrt.f32 %v1388_v27 }
 0xe32   :  { %v1750_v28 = vpop.eup %1749 }
 0xe33   :  { %v1391_v30 = vmul.f32 %v1750_v28, %v1375_v14 }
 0xe35   :  { %v1400_v32 = vmul.f32 %v1455_v29, %v1391_v30 }
 0xe36   :  { %v1752_v33 = vpop.eup %1751 }
 0xe37   :  { %v1392_v34 = vmul.f32 %v1752_v33, %v1376_v11  ;;  %v1409_v25 = vadd.f32 %v1456_v31, %v1400_v32 }
 0xe39   :  { %v1401_v35 = vmul.f32 %v1455_v29, %v1392_v34  ;;  %1411 = vst.msk [vmem:[#allocation2] sm:$0xff] %vm55_vm0, %v1409_v25 }
 0xe3b   :  { %v1410_v36 = vadd.f32 %v1456_v31, %v1401_v35 }
 0xe3d   :  { %1412 = vst.msk [vmem:[#allocation2 + $0x8] sm:$0xff] %vm55_vm0, %v1410_v36 }
 0xe3e   :  { %1764 = shalt.err (!%p1761_p4)
}
 0xe3f   :  { %s1765_s30 = scalar_lea.hbm %s2149_s13, 256 }
 0xe40   :  { %p1766_p5 = scmp.ne.s32.totalorder %s2149_s13, %s1765_s30  ;;  %p1769_p6 = scmp.lt.u32.totalorder %s1765_s30, %s2149_s13 }
 0xe42   :  { %p1771_p7 = pnand %p1769_p6, %p1766_p5 }
 0xe44   :  { %1774 = shalt.err (!%p1771_p7)
}
 0xe45   :  { %s1785_s19 = smov 128   ;;  %s1786_s5 = smov 8  }
 0xe46   :  { %1424 = dma.vmem_to_hbm [thread:$0]  %s1419_s1, 256, %s2149_s13, [#allocation3], %s1785_s19, %s1785_s19, %s1786_s5  }
 0xe47   :  { %1775 = dma.done.wait [#allocation3], 256  }
 0xe48   :  { %1776 = vsyncadd [#allocation3], 4294967040 }
 0xe49   :  { %1428 = vsyncpa [#allocation3], 1 }

</bundles_post_ra>
